<compile_context>
chip_gen: v5e
topology: v5e:2x2
jax: 0.10.0
libtpu: 0.0.40
codegen_flags: <defaults>
</compile_context>

<pallas_src>
import jax
import jax.numpy as jnp
from jax.experimental import pallas as pl
from jax.experimental.pallas import tpu as pltpu


def _fused_word_level_kernel(seq_ref, img_ref, emb_ref, w_ref, b_ref,
                             word_ref, imgf_ref):
    # ---- language embedding: tanh(one-hot(seq) @ table) on the MXU ----
    # For Vp1 = 128 the one-hot contraction is a single cheap MXU pass per
    # position.
    # TODO(synk): for realistic vocabularies (Vp1 >> a few hundred) switch this
    # to a PrefetchScalarGridSpec / pl.Element row-gather: one-hot work scales
    # as N*L*V and the table stops fitting VMEM-resident (worst on v7x VMEM).
    # NOTE: out-of-range ids (> V) give an all-zero one-hot row -> tanh(0) = 0,
    # whereas PyTorch nn.Embedding would raise; ids are assumed in-range.
    seq = seq_ref[...]                                     # (bb, L) int32
    bb, L = seq.shape
    vp1 = emb_ref.shape[0]
    emb_tbl = emb_ref[...]                                 # (Vp1, H) bf16, VMEM-resident
    lane_ids = jax.lax.broadcasted_iota(jnp.int32, (1, vp1), 1)

    cols = []
    for l in range(L):                                     # static unroll; L is small
        ids_l = seq[:, l:l + 1]                            # (bb, 1)
        onehot = (ids_l == lane_ids).astype(jnp.bfloat16)  # (bb, Vp1) bf16
        cols.append(jnp.dot(onehot, emb_tbl,
                            preferred_element_type=jnp.float32))  # (bb, H) f32
    # Lane-dense (bb, L*H) slab: per-position columns concatenated along lanes.
    word = jnp.tanh(jnp.concatenate(cols, axis=1))         # (bb, L*H) f32
    word_ref[...] = word.astype(word_ref.dtype)

    # ---- image projection: tanh(img @ W + b) on the MXU ----
    proj = jnp.dot(img_ref[...], w_ref[...], preferred_element_type=jnp.float32)
    imgf_ref[...] = jnp.tanh(proj + b_ref[...]).astype(imgf_ref.dtype)


def _vmem_per_step_bytes(bb, L, D, H, vp1, out_bytes):
    """Rough per-grid-step VMEM estimate (double-buffered streamed operands)."""
    img_in = 2 * bb * D * 2               # bf16 img tile, double-buffered
    seq_in = 2 * bb * L * 4               # int32 seq tile, double-buffered
    onehot = bb * vp1 * 2                 # bf16 one-hot (per position, reused)
    word_acc = bb * L * H * 4             # f32 per-position results before store
    word_out = 2 * bb * L * H * out_bytes
    imgf_out = 2 * bb * H * out_bytes
    resident = vp1 * H * 2 + D * H * 2 + H * 4   # emb + W (bf16) + bias (f32)
    return img_in + seq_in + onehot + word_acc + word_out + imgf_out + resident


def _pick_batch_tile(n, L, D, H, vp1, out_bytes,
                     target_rows=2048, vmem_budget=18 << 20):
    """Largest multiple-of-8 batch tile dividing N, sized for ~target_rows rows
    of embedding work per step, capped by a per-step VMEM budget (safe on
    v7x's 64 MiB as well as v5e/v6e's 128 MiB), and kept <= N//2 when possible
    so the parallel grid axis has >= 2 steps for v7x's two TensorCores."""
    if n % 8 != 0:
        return n                          # tiny/odd batch: whole batch, grid of 1
    bb = min(n, max(8, (target_rows // max(L, 1)) // 8 * 8))
    while n % bb != 0:
        bb -= 8
    while bb > 8 and _vmem_per_step_bytes(bb, L, D, H, vp1, out_bytes) > vmem_budget:
        bb -= 8
        while n % bb != 0:
            bb -= 8
    if bb == n and n >= 16 and (n // 2) % 8 == 0:
        bb = n // 2                       # >= 2 grid steps -> megacore on v7x
    return bb


def word_level_forward(seq, img, emb_table, img_w, img_b, *, out_dtype=jnp.float32):
    N, L = seq.shape
    Vp1, H = emb_table.shape
    D = img.shape[1]

    # bf16 streaming operands (the img tile dominates HBM bytes); both dots keep
    # f32 accumulation so the error stays well inside the module's 1e-2 tolerance.
    seq = seq.astype(jnp.int32)
    img_bf = img.astype(jnp.bfloat16)
    w_bf = img_w.astype(jnp.bfloat16)
    emb_bf = emb_table.astype(jnp.bfloat16)
    b_f32 = img_b.astype(jnp.float32).reshape(1, H)

    out_bytes = jnp.dtype(out_dtype).itemsize
    bb = _pick_batch_tile(N, L, D, H, Vp1, out_bytes)
    grid = (N // bb,)

    word_flat, img_feat = pl.pallas_call(
        _fused_word_level_kernel,
        out_shape=(jax.ShapeDtypeStruct((N, L * H), out_dtype),   # lane-dense slab
                   jax.ShapeDtypeStruct((N, H), out_dtype)),
        grid=grid,
        in_specs=[
            pl.BlockSpec((bb, L), lambda i: (i, 0)),       # seq batch tile
            pl.BlockSpec((bb, D), lambda i: (i, 0)),       # img batch tile (bf16)
            # Resident (constant index_map) inputs; ~80 KiB total at bf16, so the
            # default double-buffering costs negligible VMEM (single-buffering via
            # pipeline_mode=pl.Buffered(1) would only reclaim ~80 KiB of headroom).
            pl.BlockSpec((Vp1, H), lambda i: (0, 0)),      # emb table (VMEM-resident)
            pl.BlockSpec((D, H), lambda i: (0, 0)),        # img weight (VMEM-resident)
            pl.BlockSpec((1, H), lambda i: (0, 0)),        # bias (VMEM-resident)
        ],
        out_specs=(
            pl.BlockSpec((bb, L * H), lambda i: (i, 0)),   # word_feat, lane-dense
            pl.BlockSpec((bb, H), lambda i: (i, 0)),       # img_feat
        ),
        compiler_params=pltpu.CompilerParams(
            dimension_semantics=("parallel",),
            vmem_limit_bytes=32 * 1024 * 1024),
    )(seq, img_bf, emb_bf, w_bf, b_f32)

    # Layout plumbing / trivial work stays in XLA:
    word_feat = word_flat.reshape(N, L, H)   # contiguous view restore, no kernel cost
    mask = (seq == 0)                        # single VPU compare; keeps the
                                             # lane-sparse bool out of the kernel

    # TODO(synk): AlternatingAttention is referenced but not defined in the source
    # module; ques_att_w / img_att_w cannot be reproduced and are omitted.
    return word_feat, img_feat, mask


if __name__ == "__main__":
    # Small, deterministic config consistent with the module:
    #   vocab_size=127 (table rows = 128), hidden_size=32, seq_length=8,
    #   feature_type='VGG' -> img_feat_dim=512, batch N=2.
    vocab_size = 127
    hidden_size = 32
    seq_length = 8
    img_feat_dim = 512     # 'VGG'
    N = 2

    key = jax.random.PRNGKey(0)
    k_seq, k_emb, k_img, k_w, k_b = jax.random.split(key, 5)

    seq = jax.random.randint(k_seq, (N, seq_length), 0, vocab_size + 1, dtype=jnp.int32)
    seq = seq.at[0, 0].set(0).at[1, 3].set(0)          # ensure some PAD tokens for the mask
    img = jax.random.normal(k_img, (N, img_feat_dim), dtype=jnp.float32)

    emb_table = 0.02 * jax.random.normal(k_emb, (vocab_size + 1, hidden_size), dtype=jnp.float32)
    img_w = 0.02 * jax.random.normal(k_w, (img_feat_dim, hidden_size), dtype=jnp.float32)
    img_b = 0.02 * jax.random.normal(k_b, (1, hidden_size), dtype=jnp.float32)

    word_feat, img_feat, mask = word_level_forward(seq, img, emb_table, img_w, img_b)
    jax.block_until_ready((word_feat, img_feat, mask))

    # Shape checks + pure-JAX reference check.
    assert word_feat.shape == (N, seq_length, hidden_size)
    assert img_feat.shape == (N, hidden_size)
    assert mask.shape == (N, seq_length) and mask.dtype == jnp.bool_

    ref_word = jnp.tanh(emb_table[seq])
    ref_img = jnp.tanh(img @ img_w + img_b)
    ref_mask = (seq == 0)
    assert jnp.allclose(word_feat, ref_word, atol=1e-2)
    assert jnp.allclose(img_feat, ref_img, atol=1e-2)
    assert jnp.array_equal(mask, ref_mask)

    print("KERNEL_OK")
</pallas_src>

<mosaic_0001>
module attributes {stable_mosaic.version = 11 : i64} {
  func.func @_fused_word_level_kernel(%arg0: i32, %arg1: memref<2x8xi32, #tpu.memory_space<vmem>>, %arg2: memref<2x512xbf16, #tpu.memory_space<vmem>>, %arg3: memref<128x32xbf16, #tpu.memory_space<vmem>>, %arg4: memref<512x32xbf16, #tpu.memory_space<vmem>>, %arg5: memref<1x32xf32, #tpu.memory_space<vmem>>, %arg6: memref<2x256xf32, #tpu.memory_space<vmem>>, %arg7: memref<2x32xf32, #tpu.memory_space<vmem>>) attributes {dimension_semantics = [#tpu.dimension_semantics<parallel>], iteration_bounds = array<i64: 1>, scalar_prefetch = 0 : i64, scratch_operands = 0 : i64, tpu.core_type = #tpu.core_type<tc>, window_params = [{transform_indices = @transform_0, window_bounds = array<i64: 2, 8>}, {transform_indices = @transform_1, window_bounds = array<i64: 2, 512>}, {pipeline_mode = #tpu.pipeline_mode<synchronous>, transform_indices = @transform_2, window_bounds = array<i64: 128, 32>}, {pipeline_mode = #tpu.pipeline_mode<synchronous>, transform_indices = @transform_3, window_bounds = array<i64: 512, 32>}, {pipeline_mode = #tpu.pipeline_mode<synchronous>, transform_indices = @transform_4, window_bounds = array<i64: 1, 32>}, {transform_indices = @transform_5, window_bounds = array<i64: 2, 256>}, {transform_indices = @transform_6, window_bounds = array<i64: 2, 32>}]} {
    %c0 = arith.constant 0 : index
    %c0_0 = arith.constant 0 : index
    %0 = vector.load %arg1[%c0, %c0_0] : memref<2x8xi32, #tpu.memory_space<vmem>>, vector<2x8xi32>
    %c0_1 = arith.constant 0 : index
    %c0_2 = arith.constant 0 : index
    %1 = vector.load %arg3[%c0_1, %c0_2] : memref<128x32xbf16, #tpu.memory_space<vmem>>, vector<128x32xbf16>
    %2 = tpu.iota {dimensions = array<i32: 1>} : vector<1x128xi32>
    %3 = vector.extract_strided_slice %0 {offsets = [0, 0], sizes = [2, 1], strides = [1, 1]} : vector<2x8xi32> to vector<2x1xi32>
    %4 = vector.broadcast %3 : vector<2x1xi32> to vector<2x128xi32>
    %5 = vector.broadcast %2 : vector<1x128xi32> to vector<2x128xi32>
    %6 = arith.cmpi eq, %4, %5 : vector<2x128xi32>
    %7 = arith.extui %6 : vector<2x128xi1> to vector<2x128xi32>
    %8 = arith.sitofp %7 : vector<2x128xi32> to vector<2x128xf32>
    %9 = arith.truncf %8 : vector<2x128xf32> to vector<2x128xbf16>
    %cst = arith.constant dense<0.000000e+00> : vector<2x32xf32>
    %10 = tpu.matmul %9, %1, %cst {dimension_numbers = #tpu.dot_dimension_numbers<[1], [0], [0], [1], [0, 0, 1, 1], [], []>} : vector<2x128xbf16>, vector<128x32xbf16>, vector<2x32xf32> -> vector<2x32xf32>
    %11 = vector.extract_strided_slice %0 {offsets = [0, 1], sizes = [2, 1], strides = [1, 1]} : vector<2x8xi32> to vector<2x1xi32>
    %12 = vector.broadcast %11 : vector<2x1xi32> to vector<2x128xi32>
    %13 = vector.broadcast %2 : vector<1x128xi32> to vector<2x128xi32>
    %14 = arith.cmpi eq, %12, %13 : vector<2x128xi32>
    %15 = arith.extui %14 : vector<2x128xi1> to vector<2x128xi32>
    %16 = arith.sitofp %15 : vector<2x128xi32> to vector<2x128xf32>
    %17 = arith.truncf %16 : vector<2x128xf32> to vector<2x128xbf16>
    %cst_3 = arith.constant dense<0.000000e+00> : vector<2x32xf32>
    %18 = tpu.matmul %17, %1, %cst_3 {dimension_numbers = #tpu.dot_dimension_numbers<[1], [0], [0], [1], [0, 0, 1, 1], [], []>} : vector<2x128xbf16>, vector<128x32xbf16>, vector<2x32xf32> -> vector<2x32xf32>
    %19 = vector.extract_strided_slice %0 {offsets = [0, 2], sizes = [2, 1], strides = [1, 1]} : vector<2x8xi32> to vector<2x1xi32>
    %20 = vector.broadcast %19 : vector<2x1xi32> to vector<2x128xi32>
    %21 = vector.broadcast %2 : vector<1x128xi32> to vector<2x128xi32>
    %22 = arith.cmpi eq, %20, %21 : vector<2x128xi32>
    %23 = arith.extui %22 : vector<2x128xi1> to vector<2x128xi32>
    %24 = arith.sitofp %23 : vector<2x128xi32> to vector<2x128xf32>
    %25 = arith.truncf %24 : vector<2x128xf32> to vector<2x128xbf16>
    %cst_4 = arith.constant dense<0.000000e+00> : vector<2x32xf32>
    %26 = tpu.matmul %25, %1, %cst_4 {dimension_numbers = #tpu.dot_dimension_numbers<[1], [0], [0], [1], [0, 0, 1, 1], [], []>} : vector<2x128xbf16>, vector<128x32xbf16>, vector<2x32xf32> -> vector<2x32xf32>
    %27 = vector.extract_strided_slice %0 {offsets = [0, 3], sizes = [2, 1], strides = [1, 1]} : vector<2x8xi32> to vector<2x1xi32>
    %28 = vector.broadcast %27 : vector<2x1xi32> to vector<2x128xi32>
    %29 = vector.broadcast %2 : vector<1x128xi32> to vector<2x128xi32>
    %30 = arith.cmpi eq, %28, %29 : vector<2x128xi32>
    %31 = arith.extui %30 : vector<2x128xi1> to vector<2x128xi32>
    %32 = arith.sitofp %31 : vector<2x128xi32> to vector<2x128xf32>
    %33 = arith.truncf %32 : vector<2x128xf32> to vector<2x128xbf16>
    %cst_5 = arith.constant dense<0.000000e+00> : vector<2x32xf32>
    %34 = tpu.matmul %33, %1, %cst_5 {dimension_numbers = #tpu.dot_dimension_numbers<[1], [0], [0], [1], [0, 0, 1, 1], [], []>} : vector<2x128xbf16>, vector<128x32xbf16>, vector<2x32xf32> -> vector<2x32xf32>
    %35 = vector.extract_strided_slice %0 {offsets = [0, 4], sizes = [2, 1], strides = [1, 1]} : vector<2x8xi32> to vector<2x1xi32>
    %36 = vector.broadcast %35 : vector<2x1xi32> to vector<2x128xi32>
    %37 = vector.broadcast %2 : vector<1x128xi32> to vector<2x128xi32>
    %38 = arith.cmpi eq, %36, %37 : vector<2x128xi32>
    %39 = arith.extui %38 : vector<2x128xi1> to vector<2x128xi32>
    %40 = arith.sitofp %39 : vector<2x128xi32> to vector<2x128xf32>
    %41 = arith.truncf %40 : vector<2x128xf32> to vector<2x128xbf16>
    %cst_6 = arith.constant dense<0.000000e+00> : vector<2x32xf32>
    %42 = tpu.matmul %41, %1, %cst_6 {dimension_numbers = #tpu.dot_dimension_numbers<[1], [0], [0], [1], [0, 0, 1, 1], [], []>} : vector<2x128xbf16>, vector<128x32xbf16>, vector<2x32xf32> -> vector<2x32xf32>
    %43 = vector.extract_strided_slice %0 {offsets = [0, 5], sizes = [2, 1], strides = [1, 1]} : vector<2x8xi32> to vector<2x1xi32>
    %44 = vector.broadcast %43 : vector<2x1xi32> to vector<2x128xi32>
    %45 = vector.broadcast %2 : vector<1x128xi32> to vector<2x128xi32>
    %46 = arith.cmpi eq, %44, %45 : vector<2x128xi32>
    %47 = arith.extui %46 : vector<2x128xi1> to vector<2x128xi32>
    %48 = arith.sitofp %47 : vector<2x128xi32> to vector<2x128xf32>
    %49 = arith.truncf %48 : vector<2x128xf32> to vector<2x128xbf16>
    %cst_7 = arith.constant dense<0.000000e+00> : vector<2x32xf32>
    %50 = tpu.matmul %49, %1, %cst_7 {dimension_numbers = #tpu.dot_dimension_numbers<[1], [0], [0], [1], [0, 0, 1, 1], [], []>} : vector<2x128xbf16>, vector<128x32xbf16>, vector<2x32xf32> -> vector<2x32xf32>
    %51 = vector.extract_strided_slice %0 {offsets = [0, 6], sizes = [2, 1], strides = [1, 1]} : vector<2x8xi32> to vector<2x1xi32>
    %52 = vector.broadcast %51 : vector<2x1xi32> to vector<2x128xi32>
    %53 = vector.broadcast %2 : vector<1x128xi32> to vector<2x128xi32>
    %54 = arith.cmpi eq, %52, %53 : vector<2x128xi32>
    %55 = arith.extui %54 : vector<2x128xi1> to vector<2x128xi32>
    %56 = arith.sitofp %55 : vector<2x128xi32> to vector<2x128xf32>
    %57 = arith.truncf %56 : vector<2x128xf32> to vector<2x128xbf16>
    %cst_8 = arith.constant dense<0.000000e+00> : vector<2x32xf32>
    %58 = tpu.matmul %57, %1, %cst_8 {dimension_numbers = #tpu.dot_dimension_numbers<[1], [0], [0], [1], [0, 0, 1, 1], [], []>} : vector<2x128xbf16>, vector<128x32xbf16>, vector<2x32xf32> -> vector<2x32xf32>
    %59 = vector.extract_strided_slice %0 {offsets = [0, 7], sizes = [2, 1], strides = [1, 1]} : vector<2x8xi32> to vector<2x1xi32>
    %60 = vector.broadcast %59 : vector<2x1xi32> to vector<2x128xi32>
    %61 = vector.broadcast %2 : vector<1x128xi32> to vector<2x128xi32>
    %62 = arith.cmpi eq, %60, %61 : vector<2x128xi32>
    %63 = arith.extui %62 : vector<2x128xi1> to vector<2x128xi32>
    %64 = arith.sitofp %63 : vector<2x128xi32> to vector<2x128xf32>
    %65 = arith.truncf %64 : vector<2x128xf32> to vector<2x128xbf16>
    %cst_9 = arith.constant dense<0.000000e+00> : vector<2x32xf32>
    %66 = tpu.matmul %65, %1, %cst_9 {dimension_numbers = #tpu.dot_dimension_numbers<[1], [0], [0], [1], [0, 0, 1, 1], [], []>} : vector<2x128xbf16>, vector<128x32xbf16>, vector<2x32xf32> -> vector<2x32xf32>
    %67 = tpu.concatenate %10, %18, %26, %34, %42, %50, %58, %66 in 1 : vector<2x32xf32>, vector<2x32xf32>, vector<2x32xf32>, vector<2x32xf32>, vector<2x32xf32>, vector<2x32xf32>, vector<2x32xf32>, vector<2x32xf32> -> vector<2x256xf32>
    %68 = math.tanh %67 : vector<2x256xf32>
    %c0_10 = arith.constant 0 : index
    %c0_11 = arith.constant 0 : index
    %69 = vector.load %arg6[%c0_10, %c0_11] : memref<2x256xf32, #tpu.memory_space<vmem>>, vector<2x256xf32>
    tpu.vector_store %arg6[%c0_10, %c0_11], %68 {strides = array<i32>} : memref<2x256xf32, #tpu.memory_space<vmem>>, vector<2x256xf32>,
    %c0_12 = arith.constant 0 : index
    %c0_13 = arith.constant 0 : index
    %70 = vector.load %arg2[%c0_12, %c0_13] : memref<2x512xbf16, #tpu.memory_space<vmem>>, vector<2x512xbf16>
    %c0_14 = arith.constant 0 : index
    %c0_15 = arith.constant 0 : index
    %71 = vector.load %arg4[%c0_14, %c0_15] : memref<512x32xbf16, #tpu.memory_space<vmem>>, vector<512x32xbf16>
    %cst_16 = arith.constant dense<0.000000e+00> : vector<2x32xf32>
    %72 = tpu.matmul %70, %71, %cst_16 {dimension_numbers = #tpu.dot_dimension_numbers<[1], [0], [0], [1], [0, 0, 1, 1], [], []>} : vector<2x512xbf16>, vector<512x32xbf16>, vector<2x32xf32> -> vector<2x32xf32>
    %c0_17 = arith.constant 0 : index
    %c0_18 = arith.constant 0 : index
    %73 = vector.load %arg5[%c0_17, %c0_18] : memref<1x32xf32, #tpu.memory_space<vmem>>, vector<1x32xf32>
    %74 = vector.broadcast %73 : vector<1x32xf32> to vector<2x32xf32>
    %75 = arith.addf %72, %74 : vector<2x32xf32>
    %76 = math.tanh %75 : vector<2x32xf32>
    %c0_19 = arith.constant 0 : index
    %c0_20 = arith.constant 0 : index
    %77 = vector.load %arg7[%c0_19, %c0_20] : memref<2x32xf32, #tpu.memory_space<vmem>>, vector<2x32xf32>
    tpu.vector_store %arg7[%c0_19, %c0_20], %76 {strides = array<i32>} : memref<2x32xf32, #tpu.memory_space<vmem>>, vector<2x32xf32>,
    return
  }
  func.func @transform_0(%arg0: i32) -> (i32, i32) {
    %c0_i32 = arith.constant 0 : i32
    %c0_i32_0 = arith.constant 0 : i32
    return %arg0, %c0_i32 : i32, i32
  }
  func.func @transform_1(%arg0: i32) -> (i32, i32) {
    %c0_i32 = arith.constant 0 : i32
    %c0_i32_0 = arith.constant 0 : i32
    return %arg0, %c0_i32 : i32, i32
  }
  func.func @transform_2(%arg0: i32) -> (i32, i32) {
    %c0_i32 = arith.constant 0 : i32
    %c0_i32_0 = arith.constant 0 : i32
    %c0_i32_1 = arith.constant 0 : i32
    return %c0_i32, %c0_i32_0 : i32, i32
  }
  func.func @transform_3(%arg0: i32) -> (i32, i32) {
    %c0_i32 = arith.constant 0 : i32
    %c0_i32_0 = arith.constant 0 : i32
    %c0_i32_1 = arith.constant 0 : i32
    return %c0_i32, %c0_i32_0 : i32, i32
  }
  func.func @transform_4(%arg0: i32) -> (i32, i32) {
    %c0_i32 = arith.constant 0 : i32
    %c0_i32_0 = arith.constant 0 : i32
    %c0_i32_1 = arith.constant 0 : i32
    return %c0_i32, %c0_i32_0 : i32, i32
  }
  func.func @transform_5(%arg0: i32) -> (i32, i32) {
    %c0_i32 = arith.constant 0 : i32
    %c0_i32_0 = arith.constant 0 : i32
    return %arg0, %c0_i32 : i32, i32
  }
  func.func @transform_6(%arg0: i32) -> (i32, i32) {
    %c0_i32 = arith.constant 0 : i32
    %c0_i32_0 = arith.constant 0 : i32
    return %arg0, %c0_i32 : i32, i32
  }
}

</mosaic_0001>

<bundles_post_ra>
// kernel: tpu_custom_call.1
= control target key start
LH: loop header
LB: loop body
LE: loop exit
PB: predicated region body
PF: predicated region fallthrough
CT: control target
= control target key end

     0   :  { %12 = vsyncpa [#allocation3], 0  ;;  %v957_v1 = vmov 2   ;;  %v958_v2 = vmov 1   ;;  %v959_v4 = vmov 7   ;;  %s1169_s0 = inlined_call_operand.vmem [shape: s32[2,8], index: 0, kind: input, shape index: {}]   ;;  %s1170_s1 = inlined_call_operand.vmem [shape: bf16[2,512], index: 1, kind: input, shape index: {}]   ;;  %s1171_s2 = inlined_call_operand.vmem [shape: bf16[128,32], index: 2, kind: input, shape index: {}]   ;;  %s1172_s3 = inlined_call_operand.vmem [shape: bf16[512,32], index: 3, kind: input, shape index: {}]   ;;  %s1173_s4 = inlined_call_operand.vmem [shape: f32[1,32], index: 4, kind: input, shape index: {}]   ;;  %s1174_s5 = inlined_call_operand.hbm [shape: f32[2,256], index: 5, kind: output, shape index: {0}]   ;;  %s1175_s6 = inlined_call_operand.hbm [shape: f32[2,32], index: 6, kind: output, shape index: {1}]  }
   0x1   :  { %v1009_v0 = vld [vmem:[%s1169_s0] sm:$0x3]  ;;  %889 = vset.pattern.permute.xlu0 %v957_v1  ;;  %891 = vset.pattern.permute.xlu1 %v958_v2  ;;  %v842_v3 = vld [vmem:[%s1171_s2 + $0x38] sm:$0xff]  ;;  %v841_v5 = vld [vmem:[%s1171_s2 + $0x30] sm:$0xff] }
   0x2   :  { %112 = vperm.xlu1 %891, %v1009_v0   ;;  %132 = vperm.xlu0 %889, %v1009_v0  }
   0x3   :  { %893 = vset.pattern.permute.xlu2 %v959_v4  ;;  %118 = vmatpush.bf16.msra.mxu1 %v842_v3 }
   0x4   :  { %232 = vperm.xlu2 %893, %v1009_v0   ;;  %138 = vmatpush.bf16.msra.mxu2 %v842_v3 }
   0x5   :  { %13 = vsyncpa [#allocation5], 0  ;;  %158 = vmatpush.bf16.msra.mxu3 %v842_v3  ;;  %98 = vmatpush.bf16.msra.mxu0 %v842_v3  ;;  %v840_v6 = vld [vmem:[%s1171_s2 + $0x28] sm:$0xff]  ;;  %v960_v7 = vmov 3   ;;  %v961_v8 = vmov 6   ;;  %v962_v9 = vmov 5   ;;  %v41_v17 = vlaneseq }
   0x6   :  { %v839_v10 = vld [vmem:[%s1171_s2 + $0x20] sm:$0xff]  ;;  %v838_v11 = vld [vmem:[%s1171_s2 + $0x18] sm:$0xff]  ;;  %v963_v12 = vmov 0   ;;  %v837_v13 = vld [vmem:[%s1171_s2 + $0x10] sm:$0xff]  ;;  %v964_v16 = vmov 4   ;;  %s966_s26 = smov 32  }
   0x7   :  { %119 = vmatpush.bf16.msra.mxu1 %v841_v5  ;;  %v836_v14 = vld [vmem:[%s1171_s2 + $0x8] sm:$0xff]  ;;  %v835_v15 = vld [vmem:[%s1171_s2] sm:$0xff]  ;;  %v1043_v18 = vand.u32 127, %v41_v17  ;;  %v858_v22 = vld [vmem:[%s1172_s3 + $0x78] sm:$0xff]  ;;  %v965_v24 = vmov 1.0|1.0  }
   0x8   :  { %139 = vmatpush.bf16.msra.mxu2 %v841_v5  ;;  %v866_v23 = vld [vmem:[%s1172_s3 + $0xb8] sm:$0xff]  ;;  %v857_v25 = vld [vmem:[%s1172_s3 + $0x70] sm:$0xff]  ;;  %v856_v27 = vld [vmem:[%s1172_s3 + $0x68] sm:$0xff]  ;;  %s967_s0 = smov 96   ;;  %s969_s29 = smov [#allocation4]  }
   0x9   :  { %159 = vmatpush.bf16.msra.mxu3 %v841_v5  ;;  %99 = vmatpush.bf16.msra.mxu0 %v841_v5  ;;  %v865_v26 = vld [vmem:[%s1172_s3 + $0xb0] sm:$0xff]  ;;  %v874_v29 = vld [vmem:[%s1172_s3 + $0xf8] sm:$0xff]  ;;  %v864_v30 = vld [vmem:[%s1172_s3 + $0xa8] sm:$0xff]  ;;  %s635_s30 = sshll.u32 %s969_s29, 4  ;;  %s637_s9 = sshll.u32 %s1175_s6, 4  ;;  %s636_s30 = int_to_ptr.vmem [resolvable:$true] %s635_s30  ;;  %s638_s9 = int_to_ptr.hbm [resolvable:$true] %s637_s9 }
   0xa   :  { %890 = vset.pattern.permute.xlu0 %v960_v7  ;;  %892 = vset.pattern.permute.xlu1 %v961_v8  ;;  %v873_v33 = vld [vmem:[%s1172_s3 + $0xf0] sm:$0xff]  ;;  %v863_v34 = vld [vmem:[%s1172_s3 + $0xa0] sm:$0xff]  ;;  %v872_v35 = vld [vmem:[%s1172_s3 + $0xe8] sm:$0xff]  ;;  %s626_s12 = sshll.u32 %s1174_s5, 4  ;;  %s627_s12 = int_to_ptr.hbm [resolvable:$true] %s626_s12 }
   0xb   :  { %152 = vperm.xlu0 %890, %v1009_v0   ;;  %212 = vperm.xlu1 %892, %v1009_v0   ;;  %v850_v37 = vld [vmem:[%s1172_s3 + $0x38] sm:$0xff]  ;;  %v849_v38 = vld [vmem:[%s1172_s3 + $0x30] sm:$0xff]  ;;  %v848_v39 = vld [vmem:[%s1172_s3 + $0x28] sm:$0xff] }
   0xc   :  { %894 = vset.pattern.permute.xlu2 %v962_v9  ;;  %120 = vmatpush.bf16.msra.mxu1 %v840_v6  ;;  %v847_v40 = vld [vmem:[%s1172_s3 + $0x20] sm:$0xff]  ;;  %v862_v43 = vld [vmem:[%s1172_s3 + $0x98] sm:$0xff]  ;;  %v861_v47 = vld [vmem:[%s1172_s3 + $0x90] sm:$0xff] }
   0xd   :  { %192 = vperm.xlu2 %894, %v1009_v0   ;;  %140 = vmatpush.bf16.msra.mxu2 %v840_v6  ;;  %v871_v41 = vld [vmem:[%s1172_s3 + $0xe0] sm:$0xff]  ;;  %v846_v44 = vld [vmem:[%s1172_s3 + $0x18] sm:$0xff]  ;;  %v845_v48 = vld [vmem:[%s1172_s3 + $0x10] sm:$0xff] }
   0xe   :  { %160 = vmatpush.bf16.msra.mxu3 %v840_v6  ;;  %100 = vmatpush.bf16.msra.mxu0 %v840_v6  ;;  %v855_v42 = vld [vmem:[%s1172_s3 + $0x60] sm:$0xff]  ;;  %v870_v45 = vld [vmem:[%s1172_s3 + $0xd8] sm:$0xff]  ;;  %v869_v49 = vld [vmem:[%s1172_s3 + $0xd0] sm:$0xff] }
   0xf   :  { %v854_v46 = vld [vmem:[%s1172_s3 + $0x58] sm:$0xff]  ;;  %v853_v51 = vld [vmem:[%s1172_s3 + $0x50] sm:$0xff]  ;;  %v860_v52 = vld [vmem:[%s1172_s3 + $0x88] sm:$0xff] }
  0x10   :  { %121 = vmatpush.bf16.msra.mxu1 %v839_v10  ;;  %v293_v53 = vld [vmem:[%s1170_s1] sm:$0xf]  ;;  %v844_v54 = vld [vmem:[%s1172_s3 + $0x8] sm:$0xff] }
  0x11   :  { %141 = vmatpush.bf16.msra.mxu2 %v839_v10  ;;  %v868_v55 = vld [vmem:[%s1172_s3 + $0xc8] sm:$0xff]  ;;  %363 = vst [vmem:[#allocation1] ss:$9 sm:$0xff] %v293_v53  ;;  %v859_v57 = vld [vmem:[%s1172_s3 + $0x80] sm:$0xff] }
  0x12   :  { %161 = vmatpush.bf16.msra.mxu3 %v839_v10  ;;  %101 = vmatpush.bf16.msra.mxu0 %v839_v10  ;;  %v852_v56 = vld [vmem:[%s1172_s3 + $0x48] sm:$0xff]  ;;  %v843_v58 = vld [vmem:[%s1172_s3] sm:$0xff] }
  0x13   :  { %895 = vset.pattern.permute.xlu1 %v963_v12  ;;  %897 = vset.pattern.permute.xlu0 %v959_v4  ;;  %v867_v59 = vld [vmem:[%s1172_s3 + $0xc0] sm:$0xff] }
  0x14   :  { %122 = vmatpush.bf16.msra.mxu1 %v838_v11  ;;  %44 = vperm.xlu1 %895, %v1009_v0   ;;  %v851_v61 = vld [vmem:[%s1172_s3 + $0x40] sm:$0xff]  ;;  %s968_s3 = smov 64  }
  0x15   :  { %142 = vmatpush.bf16.msra.mxu2 %v838_v11  ;;  %896 = vset.pattern.permute.xlu2 %v964_v16  ;;  %v898_v17 = vld [vmem:[%s1173_s4] ss:$0 sm:$0xff]  ;;  %s970_s4 = smov [#allocation2]  }
  0x16   :  { %162 = vmatpush.bf16.msra.mxu3 %v838_v11  ;;  %102 = vmatpush.bf16.msra.mxu0 %v838_v11  ;;  %s624_s6 = sshll.u32 %s970_s4, 4  ;;  %s625_s6 = int_to_ptr.vmem [resolvable:$true] %s624_s6 }
  0x17   :  { %172 = vperm.xlu2 %896, %v1009_v0  }
  0x18   :  { %123 = vmatpush.bf16.msra.mxu1 %v837_v13  ;;  %v366_v60 = vld [vmem:[#allocation1 + $0x12] sm:$0xff]  ;;  %v364_v62 = vld [vmem:[#allocation1] sm:$0xff]  ;;  %v365_v0 = vld [vmem:[#allocation1 + $0x9] sm:$0xff] }
  0x19   :  { %143 = vmatpush.bf16.msra.mxu2 %v837_v13  ;;  %v367_v63 = vld [vmem:[#allocation1 + $0x1b] sm:$0xff] }
  0x1a   :  { %163 = vmatpush.bf16.msra.mxu3 %v837_v13  ;;  %103 = vmatpush.bf16.msra.mxu0 %v837_v13 }
  0x1c   :  { %124 = vmatpush.bf16.msra.mxu1 %v836_v14 }
  0x1d   :  { %144 = vmatpush.bf16.msra.mxu2 %v836_v14 }
  0x1e   :  { %164 = vmatpush.bf16.msra.mxu3 %v836_v14  ;;  %104 = vmatpush.bf16.msra.mxu0 %v836_v14 }
  0x20   :  { %125 = vmatpush.bf16.msra.mxu1 %v835_v15 }
  0x21   :  { %145 = vmatpush.bf16.msra.mxu2 %v835_v15 }
  0x22   :  { %165 = vmatpush.bf16.msra.mxu3 %v835_v15  ;;  %105 = vmatpush.bf16.msra.mxu0 %v835_v15 }
  0x24   :  { %198 = vmatpush.bf16.msrb.mxu1 %v842_v3 }
  0x25   :  { %218 = vmatpush.bf16.msrb.mxu2 %v842_v3 }
  0x26   :  { %238 = vmatpush.bf16.msrb.mxu3 %v842_v3  ;;  %178 = vmatpush.bf16.msrb.mxu0 %v842_v3 }
  0x28   :  { %199 = vmatpush.bf16.msrb.mxu1 %v841_v5 }
  0x29   :  { %219 = vmatpush.bf16.msrb.mxu2 %v841_v5 }
  0x2a   :  { %239 = vmatpush.bf16.msrb.mxu3 %v841_v5  ;;  %179 = vmatpush.bf16.msrb.mxu0 %v841_v5 }
  0x2c   :  { %200 = vmatpush.bf16.msrb.mxu1 %v840_v6 }
  0x2d   :  { %220 = vmatpush.bf16.msrb.mxu2 %v840_v6 }
  0x2e   :  { %240 = vmatpush.bf16.msrb.mxu3 %v840_v6  ;;  %180 = vmatpush.bf16.msrb.mxu0 %v840_v6 }
  0x30   :  { %201 = vmatpush.bf16.msrb.mxu1 %v839_v10 }
  0x31   :  { %221 = vmatpush.bf16.msrb.mxu2 %v839_v10 }
  0x32   :  { %241 = vmatpush.bf16.msrb.mxu3 %v839_v10  ;;  %181 = vmatpush.bf16.msrb.mxu0 %v839_v10 }
  0x34   :  { %202 = vmatpush.bf16.msrb.mxu1 %v838_v11 }
  0x35   :  { %222 = vmatpush.bf16.msrb.mxu2 %v838_v11 }
  0x36   :  { %242 = vmatpush.bf16.msrb.mxu3 %v838_v11  ;;  %182 = vmatpush.bf16.msrb.mxu0 %v838_v11 }
  0x38   :  { %203 = vmatpush.bf16.msrb.mxu1 %v837_v13 }
  0x39   :  { %223 = vmatpush.bf16.msrb.mxu2 %v837_v13 }
  0x3a   :  { %243 = vmatpush.bf16.msrb.mxu3 %v837_v13  ;;  %183 = vmatpush.bf16.msrb.mxu0 %v837_v13 }
  0x3c   :  { %204 = vmatpush.bf16.msrb.mxu1 %v836_v14 }
  0x3d   :  { %224 = vmatpush.bf16.msrb.mxu2 %v836_v14 }
  0x3e   :  { %244 = vmatpush.bf16.msrb.mxu3 %v836_v14  ;;  %184 = vmatpush.bf16.msrb.mxu0 %v836_v14 }
  0x40   :  { %205 = vmatpush.bf16.msrb.mxu1 %v835_v15 }
  0x41   :  { %225 = vmatpush.bf16.msrb.mxu2 %v835_v15 }
  0x42   :  { %245 = vmatpush.bf16.msrb.mxu3 %v835_v15  ;;  %185 = vmatpush.bf16.msrb.mxu0 %v835_v15 }
  0x5e   :  { %v233_v19 = vpop.permute.xlu2 %232 }
  0x5f   :  { %vm234_vm12 = vcmp.eq.s32.totalorder %v233_v19, %v1043_v18 }
  0x60   :  { %vm705_vm13 = vmpackc.low %vm234_vm12, %vm234_vm12 }
  0x67   :  { %v193_v31 = vpop.permute.xlu2 %192 }
  0x68   :  { %vm194_vm6 = vcmp.eq.s32.totalorder %v193_v31, %v1043_v18 }
  0x69   :  { %vm699_vm8 = vmpackc.low %vm194_vm6, %vm194_vm6 }
  0x71   :  { %v173_v50 = vpop.permute.xlu2 %172 }
  0x72   :  { %vm174_vm14 = vcmp.eq.s32.totalorder %v173_v50, %v1043_v18 }
  0x73   :  { %vm696_vm15 = vmpackc.low %vm174_vm14, %vm174_vm14 }
  0x74   :  { %v113_v20 = vpop.permute.xlu1 %112  ;;  %v133_v21 = vpop.permute.xlu0 %132 }
  0x75   :  { %vm114_vm0 = vcmp.eq.s32.totalorder %v113_v20, %v1043_v18  ;;  %vm134_vm1 = vcmp.eq.s32.totalorder %v133_v21, %v1043_v18 }
  0x76   :  { %vm687_vm2 = vmpackc.low %vm114_vm0, %vm114_vm0  ;;  %vm617_vm0 = vcmask 254976  }
  0x77   :  { %vm690_vm3 = vmpackc.low %vm134_vm1, %vm134_vm1  ;;  %688 = vmatmul.msk.bf16.vlgmr.msra.gmra.mxu1 %vm687_vm2, %v965_v24  ;;  %vm275_vm1 = vcmask 261120   ;;  %vm277_vm2 = vcmask 523264  }
  0x78   :  { %691 = vmatmul.msk.bf16.vlgmr.msra.gmra.mxu2 %vm690_vm3, %v965_v24  ;;  %577 = vmatpush.bf16.msra.mxu1 %v858_v22  ;;  %vm279_vm3 = vcmask 785408  }
  0x79   :  { %590 = vmatpush.bf16.msra.mxu2 %v866_v23 }
  0x7c   :  { %578 = vmatpush.bf16.msra.mxu1 %v857_v25 }
  0x7d   :  { %v153_v28 = vpop.permute.xlu0 %152  ;;  %591 = vmatpush.bf16.msra.mxu2 %v865_v26  ;;  %v213_v32 = vpop.permute.xlu1 %212 }
  0x7e   :  { %vm154_vm4 = vcmp.eq.s32.totalorder %v153_v28, %v1043_v18  ;;  %vm214_vm7 = vcmp.eq.s32.totalorder %v213_v32, %v1043_v18 }
  0x7f   :  { %vm693_vm5 = vmpackc.low %vm154_vm4, %vm154_vm4  ;;  %vm289_vm4 = vcmask 1041408  }
  0x80   :  { %694 = vmatmul.msk.bf16.vlgmr.msra.gmra.mxu3 %vm693_vm5, %v965_v24  ;;  %579 = vmatpush.bf16.msra.mxu1 %v856_v27  ;;  %vm702_vm9 = vmpackc.low %vm214_vm7, %vm214_vm7 }
  0x81   :  { %603 = vmatpush.bf16.msra.mxu3 %v874_v29  ;;  %592 = vmatpush.bf16.msra.mxu2 %v864_v30 }
  0x84   :  { %580 = vmatpush.bf16.msra.mxu1 %v855_v42 }
  0x85   :  { %604 = vmatpush.bf16.msra.mxu3 %v873_v33  ;;  %593 = vmatpush.bf16.msra.mxu2 %v863_v34 }
  0x86   :  { %v45_v36 = vpop.permute.xlu1 %44 }
  0x87   :  { %700 = vmatmul.msk.bf16.vlgmr.msrb.gmra.mxu1 %vm699_vm8, %v965_v24  ;;  %vm46_vm10 = vcmp.eq.s32.totalorder %v45_v36, %v1043_v18 }
  0x88   :  { %703 = vmatmul.msk.bf16.vlgmr.msrb.gmra.mxu2 %vm702_vm9, %v965_v24  ;;  %vm684_vm11 = vmpackc.low %vm46_vm10, %vm46_vm10  ;;  %581 = vmatpush.bf16.msra.mxu1 %v854_v46 }
  0x89   :  { %685 = vmatmul.msk.bf16.vlgmr.msra.gmra.mxu0 %vm684_vm11, %v965_v24  ;;  %605 = vmatpush.bf16.msra.mxu3 %v872_v35 }
  0x8a   :  { %564 = vmatpush.bf16.msra.mxu0 %v850_v37  ;;  %594 = vmatpush.bf16.msra.mxu2 %v862_v43 }
  0x8c   :  { %582 = vmatpush.bf16.msra.mxu1 %v853_v51 }
  0x8d   :  { %606 = vmatpush.bf16.msra.mxu3 %v871_v41 }
  0x8e   :  { %565 = vmatpush.bf16.msra.mxu0 %v849_v38  ;;  %595 = vmatpush.bf16.msra.mxu2 %v861_v47 }
  0x90   :  { %706 = vmatmul.msk.bf16.vlgmr.msrb.gmra.mxu3 %vm705_vm13, %v965_v24  ;;  %583 = vmatpush.bf16.msra.mxu1 %v852_v56 }
  0x91   :  { %607 = vmatpush.bf16.msra.mxu3 %v870_v45 }
  0x92   :  { %566 = vmatpush.bf16.msra.mxu0 %v848_v39  ;;  %596 = vmatpush.bf16.msra.mxu2 %v860_v52 }
  0x94   :  { %584 = vmatpush.bf16.msra.mxu1 %v851_v61 }
  0x95   :  { %608 = vmatpush.bf16.msra.mxu3 %v869_v49 }
  0x96   :  { %567 = vmatpush.bf16.msra.mxu0 %v847_v40  ;;  %597 = vmatpush.bf16.msra.mxu2 %v859_v57 }
  0x97   :  { %585 = vmatmul.bf16.vlgmr.msra.gmra.mxu1 %v365_v0 }
  0x99   :  { %697 = vmatmul.msk.bf16.vlgmr.msrb.gmra.mxu0 %vm696_vm15, %v965_v24  ;;  %609 = vmatpush.bf16.msra.mxu3 %v868_v55 }
  0x9a   :  { %568 = vmatpush.bf16.msra.mxu0 %v846_v44  ;;  %598 = vmatmul.bf16.vlgmr.msra.gmra.mxu2 %v366_v60 }
  0x9d   :  { %610 = vmatpush.bf16.msra.mxu3 %v867_v59 }
  0x9e   :  { %569 = vmatpush.bf16.msra.mxu0 %v845_v48 }
  0xa0   :  { %611 = vmatmul.bf16.vlgmr.msra.gmra.mxu3 %v367_v63 }
  0xa2   :  { %570 = vmatpush.bf16.msra.mxu0 %v844_v54 }
  0xa6   :  { %571 = vmatpush.bf16.msra.mxu0 %v843_v58 }
  0xa9   :  { %572 = vmatmul.bf16.vlgmr.msra.gmra.mxu0 %v364_v62 }
  0xf4   :  { %v127_v1 = vpop.f32.mrf.mxu1 }
  0xf5   :  { %252 = vrot.lane.b32.xlu2 %v127_v1, %s966_s26 }
  0xfb   :  { %v147_v2 = vpop.f32.mrf.mxu2 }
  0xfc   :  { %v129_v3 = vpop.f32.mrf.mxu1 }
 0x103   :  { %v149_v4 = vpop.f32.mrf.mxu2  ;;  %v167_v5 = vpop.f32.mrf.mxu3 }
 0x104   :  { %v207_v6 = vpop.f32.mrf.mxu1  ;;  %260 = vrot.lane.b32.xlu2 %v167_v5, %s967_s0 }
 0x105   :  { %264 = vrot.lane.b32.xlu0 %v207_v6, %s966_s26 }
 0x106   :  { %v107_v13 = vpop.f32.mrf.mxu0 }
 0x10b   :  { %v227_v7 = vpop.f32.mrf.mxu2  ;;  %v169_v8 = vpop.f32.mrf.mxu3 }
 0x10c   :  { %268 = vrot.lane.b32.xlu1 %v227_v7, %s968_s3  ;;  %v209_v9 = vpop.f32.mrf.mxu1 }
 0x10e   :  { %v109_v14 = vpop.f32.mrf.mxu0 }
 0x113   :  { %v229_v10 = vpop.f32.mrf.mxu2  ;;  %v247_v11 = vpop.f32.mrf.mxu3 }
 0x114   :  { %256 = vrot.lane.b32.xlu1 %v147_v2, %s968_s3  ;;  %272 = vrot.lane.b32.xlu0 %v247_v11, %s967_s0  ;;  %v586_v20 = vpop.f32.mrf.mxu1 }
 0x116   :  { %v187_v15 = vpop.f32.mrf.mxu0 }
 0x11b   :  { %v249_v12 = vpop.f32.mrf.mxu3 }
 0x11c   :  { %v588_v26 = vpop.f32.mrf.mxu1 }
 0x11d   :  { %v599_v22 = vpop.f32.mrf.mxu2 }
 0x11e   :  { %v189_v16 = vpop.f32.mrf.mxu0 }
 0x123   :  { %v612_v23 = vpop.f32.mrf.mxu3 }
 0x125   :  { %v601_v28 = vpop.f32.mrf.mxu2 }
 0x126   :  { %v573_v18 = vpop.f32.mrf.mxu0 }
 0x127   :  { %v574_v19 = vadd.f32 %v898_v17, %v573_v18 }
 0x129   :  { %v587_v21 = vadd.f32 %v586_v20, %v574_v19 }
 0x12b   :  { %v600_v24 = vadd.f32 %v599_v22, %v587_v21  ;;  %v614_v29 = vpop.f32.mrf.mxu3 }
 0x12d   :  { %v613_v27 = vadd.f32 %v612_v23, %v600_v24 }
 0x12e   :  { %v575_v25 = vpop.f32.mrf.mxu0 }
 0x12f   :  { %899 = vtanh.f32 %v613_v27 }
 0x135   :  { %v900_v30 = vpop.eup %899 }
 0x136   :  { %618 = vst.msk [vmem:[#allocation4] sm:$0x3] %vm617_vm0, %v900_v30 }
 0x137   :  { %640 = dma.vmem_to_hbm [thread:$0]  %s636_s30, 32, %s638_s9, [#allocation5]  }
 0x14f   :  { %v253_v31 = vpop.permute.xlu2 %252 }
 0x150   :  { %v276_v35 = vsel %vm275_vm1, %v107_v13, %v253_v31 }
 0x15e   :  { %v261_v39 = vpop.permute.xlu2 %260 }
 0x177   :  { %v265_v32 = vpop.permute.xlu0 %264 }
 0x178   :  { %v281_v34 = vsel %vm275_vm1, %v187_v15, %v265_v32 }
 0x17e   :  { %v269_v33 = vpop.permute.xlu1 %268 }
 0x17f   :  { %v282_v36 = vsel %vm277_vm2, %v281_v34, %v269_v33 }
 0x186   :  { %v257_v37 = vpop.permute.xlu1 %256  ;;  %v273_v38 = vpop.permute.xlu0 %272 }
 0x187   :  { %v278_v40 = vsel %vm277_vm2, %v276_v35, %v257_v37  ;;  %v283_v41 = vsel %vm279_vm3, %v282_v36, %v273_v38 }
 0x188   :  { %v280_v42 = vsel %vm279_vm3, %v278_v40, %v261_v39  ;;  %901 = vtanh.f32 %v283_v41 }
 0x189   :  { %903 = vtanh.f32 %v280_v42 }
 0x18e   :  { %v902_v43 = vpop.eup %901 }
 0x18f   :  { %v288_v44 = vrot.slane %v902_v43, 6  ;;  %v904_v45 = vpop.eup %903 }
 0x191   :  { %v290_v46 = vsel %vm289_vm4, %v904_v45, %v288_v44 }
 0x192   :  { %292 = vst [vmem:[#allocation2] sm:$0xf] %v290_v46 }
 0x193   :  { %629 = dma.vmem_to_hbm [thread:$0]  %s625_s6, 64, %s627_s12, [#allocation3]  }
 0x194   :  { %953 = dma.done.wait [#allocation3], 64  }
 0x195   :  { %954 = vsyncadd [#allocation3], 4294967232 }
 0x196   :  { %955 = dma.done.wait [#allocation5], 32  }
 0x197   :  { %956 = vsyncadd [#allocation5], 4294967264 }
 0x198   :  { %649 = vsyncpa [#allocation3], 1 }
 0x199   :  { %650 = vsyncpa [#allocation5], 1 }

</bundles_post_ra>
